<compile_context>
chip_gen: v7x
topology: tpu7x:2x2x1
jax: 0.10.0
libtpu: 0.0.40
codegen_flags: <defaults>
</compile_context>

<pallas_src>
import math

import jax
import jax.numpy as jnp
from jax import lax
from jax.experimental import pallas as pl
from jax.experimental.pallas import tpu as pltpu


def _stl_attention_kernel(num_heads, head_dim, scale):
    """Fused STL forward for one batch tile:
    keys = tanh(embed); Q/K/V projections; per-head softmax attention; concat heads."""

    def kernel(x_ref, emb_ref, wq_t_ref, wk_t_ref, wv_t_ref, o_ref):
        x = x_ref[...].astype(jnp.float32)                       # (tN, d_q)
        keys = jnp.tanh(emb_ref[...].astype(jnp.float32))        # (Tk, d_k)

        wq_t = wq_t_ref[...].astype(jnp.float32)                 # (d_q, E)
        wk_t = wk_t_ref[...].astype(jnp.float32)                 # (d_k, E)
        wv_t = wv_t_ref[...].astype(jnp.float32)                 # (d_k, E)

        # Projections (f32 MXU accumulation), E on the lane axis.
        q = jnp.dot(x, wq_t, preferred_element_type=jnp.float32)     # (tN, E)
        k = jnp.dot(keys, wk_t, preferred_element_type=jnp.float32)  # (Tk, E)
        v = jnp.dot(keys, wv_t, preferred_element_type=jnp.float32)  # (Tk, E)

        # Heads are few and static -> unrolled Python loop, everything stays 2-D.
        head_outs = []
        for h in range(num_heads):
            lo = h * head_dim
            hi = lo + head_dim
            qh = q[:, lo:hi]                                      # (tN, dh)
            kh = k[:, lo:hi]                                      # (Tk, dh)
            vh = v[:, lo:hi]                                      # (Tk, dh)
            # scores[n, t] = <qh[n], kh[t]> * scale  (contraction on last dims,
            # no explicit transpose needed)
            s = lax.dot_general(
                qh, kh, (((1,), (1,)), ((), ())),
                preferred_element_type=jnp.float32) * scale       # (tN, Tk)
            # Numerically-stable softmax over tokens.
            s = s - jnp.max(s, axis=-1, keepdims=True)
            p = jnp.exp(s)
            p = p / jnp.sum(p, axis=-1, keepdims=True)
            head_outs.append(
                jnp.dot(p, vh, preferred_element_type=jnp.float32))  # (tN, dh)

        out = jnp.concatenate(head_outs, axis=-1)                 # (tN, E)
        o_ref[...] = out.astype(o_ref.dtype)

    return kernel


def stl_forward(inputs, embed, w_query, w_key, w_value, *, num_heads,
                batch_tile=256):
    """STL forward.

    inputs:  (N, E//2)
    embed:   (token_num, E // num_heads)          (raw parameter; tanh applied in-kernel)
    w_query: (E, E//2)      -- PyTorch nn.Linear weight layout (out, in)
    w_key:   (E, E//num_heads)
    w_value: (E, E//num_heads)
    returns: (N, 1, E)
    """
    N, d_q = inputs.shape
    token_num, d_k = embed.shape
    E = w_query.shape[0]
    assert w_query.shape == (E, d_q)
    assert w_key.shape == (E, d_k) and w_value.shape == (E, d_k)
    assert E % num_heads == 0
    head_dim = E // num_heads
    # PyTorch: scores / key_dim ** 0.5 with key_dim == d_k == E // num_heads
    scale = 1.0 / math.sqrt(d_k)

    # Lane-dense weight layout: (in, out) so the E output axis maps to lanes.
    wq_t = jnp.transpose(w_query)
    wk_t = jnp.transpose(w_key)
    wv_t = jnp.transpose(w_value)

    # Tile the batch axis so the auto-pipeliner has grid steps to double-buffer
    # when N is large; tiny N just uses a single full-extent block.
    tN = N if N <= batch_tile else batch_tile
    grid = (pl.cdiv(N, tN),)

    out2d = pl.pallas_call(
        _stl_attention_kernel(num_heads, head_dim, scale),
        out_shape=jax.ShapeDtypeStruct((N, E), inputs.dtype),
        grid_spec=pltpu.PrefetchScalarGridSpec(
            num_scalar_prefetch=0,
            grid=grid,
            in_specs=[
                pl.BlockSpec((tN, d_q), lambda i: (i, 0)),          # inputs tile
                pl.BlockSpec((token_num, d_k), lambda i: (0, 0)),   # embed (resident)
                pl.BlockSpec((d_q, E), lambda i: (0, 0)),           # Wq^T (resident)
                pl.BlockSpec((d_k, E), lambda i: (0, 0)),           # Wk^T (resident)
                pl.BlockSpec((d_k, E), lambda i: (0, 0)),           # Wv^T (resident)
            ],
            out_specs=pl.BlockSpec((tN, E), lambda i: (i, 0)),
        ),
        compiler_params=pltpu.CompilerParams(
            dimension_semantics=("parallel",),          # batch tiles shard across TCs
            vmem_limit_bytes=32 * 1024 * 1024,
        ),
    )(inputs, embed, wq_t, wk_t, wv_t)

    # The PyTorch module returns (N, T_q, E) with T_q == 1.
    return out2d.reshape(N, 1, E)


def stl_reference(inputs, embed, w_query, w_key, w_value, *, num_heads):
    """Pure-JAX reference matching the PyTorch forward."""
    N = inputs.shape[0]
    d_k = embed.shape[1]
    query = inputs[:, None, :]                                     # (N, 1, d_q)
    keys = jnp.broadcast_to(jnp.tanh(embed)[None], (N,) + embed.shape)
    q = query @ w_query.T                                          # (N, 1, E)
    k = keys @ w_key.T                                             # (N, Tk, E)
    v = keys @ w_value.T
    qh = jnp.stack(jnp.split(q, num_heads, axis=2), axis=0)        # (H, N, 1, dh)
    kh = jnp.stack(jnp.split(k, num_heads, axis=2), axis=0)
    vh = jnp.stack(jnp.split(v, num_heads, axis=2), axis=0)
    scores = jnp.matmul(qh, jnp.swapaxes(kh, 2, 3)) / (d_k ** 0.5)
    probs = jax.nn.softmax(scores, axis=3)
    out = jnp.matmul(probs, vh)                                    # (H, N, 1, dh)
    out = jnp.concatenate(jnp.split(out, num_heads, axis=0), axis=3)[0]
    return out                                                     # (N, 1, E)


if __name__ == "__main__":
    # Small shapes consistent with the module: N=2, token_num=10, E=32, heads=4.
    token_num, E, num_heads, N = 10, 32, 4, 2
    d_q = E // 2
    d_k = E // num_heads

    key = jax.random.PRNGKey(0)
    k_in, k_emb, k_wq, k_wk, k_wv = jax.random.split(key, 5)

    inputs = jax.random.normal(k_in, (N, d_q), dtype=jnp.float32)
    # embed ~ Normal(0, 0.5) as in the PyTorch init.
    embed = 0.5 * jax.random.normal(k_emb, (token_num, d_k), dtype=jnp.float32)
    # nn.Linear default init is U(-1/sqrt(fan_in), 1/sqrt(fan_in)); deterministic here.
    wq = jax.random.uniform(k_wq, (E, d_q), jnp.float32, -1.0, 1.0) / (d_q ** 0.5)
    wk = jax.random.uniform(k_wk, (E, d_k), jnp.float32, -1.0, 1.0) / (d_k ** 0.5)
    wv = jax.random.uniform(k_wv, (E, d_k), jnp.float32, -1.0, 1.0) / (d_k ** 0.5)

    out = stl_forward(inputs, embed, wq, wk, wv, num_heads=num_heads)
    out = jax.block_until_ready(out)

    ref = stl_reference(inputs, embed, wq, wk, wv, num_heads=num_heads)
    assert out.shape == (N, 1, E), out.shape
    assert jnp.allclose(out, ref, atol=1e-4, rtol=1e-4), (
        "mismatch vs reference, max abs err = "
        + str(float(jnp.max(jnp.abs(out - ref)))))
    print("KERNEL_OK")
</pallas_src>

<mosaic_0001>
module attributes {stable_mosaic.version = 11 : i64} {
  func.func @kernel(%arg0: i32, %arg1: memref<2x16xf32, #tpu.memory_space<vmem>>, %arg2: memref<10x8xf32, #tpu.memory_space<vmem>>, %arg3: memref<16x32xf32, #tpu.memory_space<vmem>>, %arg4: memref<8x32xf32, #tpu.memory_space<vmem>>, %arg5: memref<8x32xf32, #tpu.memory_space<vmem>>, %arg6: memref<2x32xf32, #tpu.memory_space<vmem>>) attributes {dimension_semantics = [#tpu.dimension_semantics<parallel>], iteration_bounds = array<i64: 1>, scalar_prefetch = 0 : i64, scratch_operands = 0 : i64, tpu.core_type = #tpu.core_type<tc>, window_params = [{transform_indices = @transform_0, window_bounds = array<i64: 2, 16>}, {pipeline_mode = #tpu.pipeline_mode<synchronous>, transform_indices = @transform_1, window_bounds = array<i64: 10, 8>}, {pipeline_mode = #tpu.pipeline_mode<synchronous>, transform_indices = @transform_2, window_bounds = array<i64: 16, 32>}, {pipeline_mode = #tpu.pipeline_mode<synchronous>, transform_indices = @transform_3, window_bounds = array<i64: 8, 32>}, {pipeline_mode = #tpu.pipeline_mode<synchronous>, transform_indices = @transform_4, window_bounds = array<i64: 8, 32>}, {transform_indices = @transform_5, window_bounds = array<i64: 2, 32>}]} {
    %c0 = arith.constant 0 : index
    %c0_0 = arith.constant 0 : index
    %0 = vector.load %arg1[%c0, %c0_0] : memref<2x16xf32, #tpu.memory_space<vmem>>, vector<2x16xf32>
    %c0_1 = arith.constant 0 : index
    %c0_2 = arith.constant 0 : index
    %1 = vector.load %arg2[%c0_1, %c0_2] : memref<10x8xf32, #tpu.memory_space<vmem>>, vector<10x8xf32>
    %2 = math.tanh %1 : vector<10x8xf32>
    %c0_3 = arith.constant 0 : index
    %c0_4 = arith.constant 0 : index
    %3 = vector.load %arg3[%c0_3, %c0_4] : memref<16x32xf32, #tpu.memory_space<vmem>>, vector<16x32xf32>
    %c0_5 = arith.constant 0 : index
    %c0_6 = arith.constant 0 : index
    %4 = vector.load %arg4[%c0_5, %c0_6] : memref<8x32xf32, #tpu.memory_space<vmem>>, vector<8x32xf32>
    %c0_7 = arith.constant 0 : index
    %c0_8 = arith.constant 0 : index
    %5 = vector.load %arg5[%c0_7, %c0_8] : memref<8x32xf32, #tpu.memory_space<vmem>>, vector<8x32xf32>
    %cst = arith.constant dense<0.000000e+00> : vector<2x32xf32>
    %6 = tpu.matmul %0, %3, %cst {dimension_numbers = #tpu.dot_dimension_numbers<[1], [0], [0], [1], [0, 0, 1, 1], [], []>} : vector<2x16xf32>, vector<16x32xf32>, vector<2x32xf32> -> vector<2x32xf32>
    %cst_9 = arith.constant dense<0.000000e+00> : vector<10x32xf32>
    %7 = tpu.matmul %2, %4, %cst_9 {dimension_numbers = #tpu.dot_dimension_numbers<[1], [0], [0], [1], [0, 0, 1, 1], [], []>} : vector<10x8xf32>, vector<8x32xf32>, vector<10x32xf32> -> vector<10x32xf32>
    %cst_10 = arith.constant dense<0.000000e+00> : vector<10x32xf32>
    %8 = tpu.matmul %2, %5, %cst_10 {dimension_numbers = #tpu.dot_dimension_numbers<[1], [0], [0], [1], [0, 0, 1, 1], [], []>} : vector<10x8xf32>, vector<8x32xf32>, vector<10x32xf32> -> vector<10x32xf32>
    %9 = vector.extract_strided_slice %6 {offsets = [0, 0], sizes = [2, 8], strides = [1, 1]} : vector<2x32xf32> to vector<2x8xf32>
    %10 = vector.extract_strided_slice %7 {offsets = [0, 0], sizes = [10, 8], strides = [1, 1]} : vector<10x32xf32> to vector<10x8xf32>
    %11 = vector.extract_strided_slice %8 {offsets = [0, 0], sizes = [10, 8], strides = [1, 1]} : vector<10x32xf32> to vector<10x8xf32>
    %cst_11 = arith.constant dense<0.000000e+00> : vector<2x10xf32>
    %12 = tpu.matmul %9, %10, %cst_11 {dimension_numbers = #tpu.dot_dimension_numbers<[1], [1], [0], [0], [0, 0, 1, 0], [], []>} : vector<2x8xf32>, vector<10x8xf32>, vector<2x10xf32> -> vector<2x10xf32>
    %cst_12 = arith.constant 0.353553385 : f32
    %13 = vector.broadcast %cst_12 : f32 to vector<2x10xf32>
    %14 = arith.mulf %12, %13 : vector<2x10xf32>
    %cst_13 = arith.constant dense<0xFF800000> : vector<2xf32>
    %15 = vector.multi_reduction <maximumf>, %14, %cst_13 [1] : vector<2x10xf32> to vector<2xf32>
    %16 = vector.shape_cast %15 : vector<2xf32> to vector<2x1xf32>
    %17 = vector.broadcast %16 : vector<2x1xf32> to vector<2x10xf32>
    %18 = arith.subf %14, %17 : vector<2x10xf32>
    %19 = math.exp %18 : vector<2x10xf32>
    %cst_14 = arith.constant dense<0.000000e+00> : vector<2xf32>
    %20 = vector.multi_reduction <add>, %19, %cst_14 [1] : vector<2x10xf32> to vector<2xf32>
    %21 = vector.shape_cast %20 : vector<2xf32> to vector<2x1xf32>
    %22 = vector.broadcast %21 : vector<2x1xf32> to vector<2x10xf32>
    %23 = arith.divf %19, %22 : vector<2x10xf32>
    %cst_15 = arith.constant dense<0.000000e+00> : vector<2x8xf32>
    %24 = tpu.matmul %23, %11, %cst_15 {dimension_numbers = #tpu.dot_dimension_numbers<[1], [0], [0], [1], [0, 0, 1, 1], [], []>} : vector<2x10xf32>, vector<10x8xf32>, vector<2x8xf32> -> vector<2x8xf32>
    %25 = vector.extract_strided_slice %6 {offsets = [0, 8], sizes = [2, 8], strides = [1, 1]} : vector<2x32xf32> to vector<2x8xf32>
    %26 = vector.extract_strided_slice %7 {offsets = [0, 8], sizes = [10, 8], strides = [1, 1]} : vector<10x32xf32> to vector<10x8xf32>
    %27 = vector.extract_strided_slice %8 {offsets = [0, 8], sizes = [10, 8], strides = [1, 1]} : vector<10x32xf32> to vector<10x8xf32>
    %cst_16 = arith.constant dense<0.000000e+00> : vector<2x10xf32>
    %28 = tpu.matmul %25, %26, %cst_16 {dimension_numbers = #tpu.dot_dimension_numbers<[1], [1], [0], [0], [0, 0, 1, 0], [], []>} : vector<2x8xf32>, vector<10x8xf32>, vector<2x10xf32> -> vector<2x10xf32>
    %cst_17 = arith.constant 0.353553385 : f32
    %29 = vector.broadcast %cst_17 : f32 to vector<2x10xf32>
    %30 = arith.mulf %28, %29 : vector<2x10xf32>
    %cst_18 = arith.constant dense<0xFF800000> : vector<2xf32>
    %31 = vector.multi_reduction <maximumf>, %30, %cst_18 [1] : vector<2x10xf32> to vector<2xf32>
    %32 = vector.shape_cast %31 : vector<2xf32> to vector<2x1xf32>
    %33 = vector.broadcast %32 : vector<2x1xf32> to vector<2x10xf32>
    %34 = arith.subf %30, %33 : vector<2x10xf32>
    %35 = math.exp %34 : vector<2x10xf32>
    %cst_19 = arith.constant dense<0.000000e+00> : vector<2xf32>
    %36 = vector.multi_reduction <add>, %35, %cst_19 [1] : vector<2x10xf32> to vector<2xf32>
    %37 = vector.shape_cast %36 : vector<2xf32> to vector<2x1xf32>
    %38 = vector.broadcast %37 : vector<2x1xf32> to vector<2x10xf32>
    %39 = arith.divf %35, %38 : vector<2x10xf32>
    %cst_20 = arith.constant dense<0.000000e+00> : vector<2x8xf32>
    %40 = tpu.matmul %39, %27, %cst_20 {dimension_numbers = #tpu.dot_dimension_numbers<[1], [0], [0], [1], [0, 0, 1, 1], [], []>} : vector<2x10xf32>, vector<10x8xf32>, vector<2x8xf32> -> vector<2x8xf32>
    %41 = vector.extract_strided_slice %6 {offsets = [0, 16], sizes = [2, 8], strides = [1, 1]} : vector<2x32xf32> to vector<2x8xf32>
    %42 = vector.extract_strided_slice %7 {offsets = [0, 16], sizes = [10, 8], strides = [1, 1]} : vector<10x32xf32> to vector<10x8xf32>
    %43 = vector.extract_strided_slice %8 {offsets = [0, 16], sizes = [10, 8], strides = [1, 1]} : vector<10x32xf32> to vector<10x8xf32>
    %cst_21 = arith.constant dense<0.000000e+00> : vector<2x10xf32>
    %44 = tpu.matmul %41, %42, %cst_21 {dimension_numbers = #tpu.dot_dimension_numbers<[1], [1], [0], [0], [0, 0, 1, 0], [], []>} : vector<2x8xf32>, vector<10x8xf32>, vector<2x10xf32> -> vector<2x10xf32>
    %cst_22 = arith.constant 0.353553385 : f32
    %45 = vector.broadcast %cst_22 : f32 to vector<2x10xf32>
    %46 = arith.mulf %44, %45 : vector<2x10xf32>
    %cst_23 = arith.constant dense<0xFF800000> : vector<2xf32>
    %47 = vector.multi_reduction <maximumf>, %46, %cst_23 [1] : vector<2x10xf32> to vector<2xf32>
    %48 = vector.shape_cast %47 : vector<2xf32> to vector<2x1xf32>
    %49 = vector.broadcast %48 : vector<2x1xf32> to vector<2x10xf32>
    %50 = arith.subf %46, %49 : vector<2x10xf32>
    %51 = math.exp %50 : vector<2x10xf32>
    %cst_24 = arith.constant dense<0.000000e+00> : vector<2xf32>
    %52 = vector.multi_reduction <add>, %51, %cst_24 [1] : vector<2x10xf32> to vector<2xf32>
    %53 = vector.shape_cast %52 : vector<2xf32> to vector<2x1xf32>
    %54 = vector.broadcast %53 : vector<2x1xf32> to vector<2x10xf32>
    %55 = arith.divf %51, %54 : vector<2x10xf32>
    %cst_25 = arith.constant dense<0.000000e+00> : vector<2x8xf32>
    %56 = tpu.matmul %55, %43, %cst_25 {dimension_numbers = #tpu.dot_dimension_numbers<[1], [0], [0], [1], [0, 0, 1, 1], [], []>} : vector<2x10xf32>, vector<10x8xf32>, vector<2x8xf32> -> vector<2x8xf32>
    %57 = vector.extract_strided_slice %6 {offsets = [0, 24], sizes = [2, 8], strides = [1, 1]} : vector<2x32xf32> to vector<2x8xf32>
    %58 = vector.extract_strided_slice %7 {offsets = [0, 24], sizes = [10, 8], strides = [1, 1]} : vector<10x32xf32> to vector<10x8xf32>
    %59 = vector.extract_strided_slice %8 {offsets = [0, 24], sizes = [10, 8], strides = [1, 1]} : vector<10x32xf32> to vector<10x8xf32>
    %cst_26 = arith.constant dense<0.000000e+00> : vector<2x10xf32>
    %60 = tpu.matmul %57, %58, %cst_26 {dimension_numbers = #tpu.dot_dimension_numbers<[1], [1], [0], [0], [0, 0, 1, 0], [], []>} : vector<2x8xf32>, vector<10x8xf32>, vector<2x10xf32> -> vector<2x10xf32>
    %cst_27 = arith.constant 0.353553385 : f32
    %61 = vector.broadcast %cst_27 : f32 to vector<2x10xf32>
    %62 = arith.mulf %60, %61 : vector<2x10xf32>
    %cst_28 = arith.constant dense<0xFF800000> : vector<2xf32>
    %63 = vector.multi_reduction <maximumf>, %62, %cst_28 [1] : vector<2x10xf32> to vector<2xf32>
    %64 = vector.shape_cast %63 : vector<2xf32> to vector<2x1xf32>
    %65 = vector.broadcast %64 : vector<2x1xf32> to vector<2x10xf32>
    %66 = arith.subf %62, %65 : vector<2x10xf32>
    %67 = math.exp %66 : vector<2x10xf32>
    %cst_29 = arith.constant dense<0.000000e+00> : vector<2xf32>
    %68 = vector.multi_reduction <add>, %67, %cst_29 [1] : vector<2x10xf32> to vector<2xf32>
    %69 = vector.shape_cast %68 : vector<2xf32> to vector<2x1xf32>
    %70 = vector.broadcast %69 : vector<2x1xf32> to vector<2x10xf32>
    %71 = arith.divf %67, %70 : vector<2x10xf32>
    %cst_30 = arith.constant dense<0.000000e+00> : vector<2x8xf32>
    %72 = tpu.matmul %71, %59, %cst_30 {dimension_numbers = #tpu.dot_dimension_numbers<[1], [0], [0], [1], [0, 0, 1, 1], [], []>} : vector<2x10xf32>, vector<10x8xf32>, vector<2x8xf32> -> vector<2x8xf32>
    %73 = tpu.concatenate %24, %40, %56, %72 in 1 : vector<2x8xf32>, vector<2x8xf32>, vector<2x8xf32>, vector<2x8xf32> -> vector<2x32xf32>
    %c0_31 = arith.constant 0 : index
    %c0_32 = arith.constant 0 : index
    %74 = vector.load %arg6[%c0_31, %c0_32] : memref<2x32xf32, #tpu.memory_space<vmem>>, vector<2x32xf32>
    tpu.vector_store %arg6[%c0_31, %c0_32], %73 {strides = array<i32>} : memref<2x32xf32, #tpu.memory_space<vmem>>, vector<2x32xf32>,
    return
  }
  func.func @transform_0(%arg0: i32) -> (i32, i32) {
    %c0_i32 = arith.constant 0 : i32
    %c0_i32_0 = arith.constant 0 : i32
    return %arg0, %c0_i32 : i32, i32
  }
  func.func @transform_1(%arg0: i32) -> (i32, i32) {
    %c0_i32 = arith.constant 0 : i32
    %c0_i32_0 = arith.constant 0 : i32
    %c0_i32_1 = arith.constant 0 : i32
    return %c0_i32, %c0_i32_0 : i32, i32
  }
  func.func @transform_2(%arg0: i32) -> (i32, i32) {
    %c0_i32 = arith.constant 0 : i32
    %c0_i32_0 = arith.constant 0 : i32
    %c0_i32_1 = arith.constant 0 : i32
    return %c0_i32, %c0_i32_0 : i32, i32
  }
  func.func @transform_3(%arg0: i32) -> (i32, i32) {
    %c0_i32 = arith.constant 0 : i32
    %c0_i32_0 = arith.constant 0 : i32
    %c0_i32_1 = arith.constant 0 : i32
    return %c0_i32, %c0_i32_0 : i32, i32
  }
  func.func @transform_4(%arg0: i32) -> (i32, i32) {
    %c0_i32 = arith.constant 0 : i32
    %c0_i32_0 = arith.constant 0 : i32
    %c0_i32_1 = arith.constant 0 : i32
    return %c0_i32, %c0_i32_0 : i32, i32
  }
  func.func @transform_5(%arg0: i32) -> (i32, i32) {
    %c0_i32 = arith.constant 0 : i32
    %c0_i32_0 = arith.constant 0 : i32
    return %arg0, %c0_i32 : i32, i32
  }
}

</mosaic_0001>

<bundles_post_ra>
// kernel: tpu_custom_call.1
= control target key start
LH: loop header
LB: loop body
LE: loop exit
PB: predicated region body
PF: predicated region fallthrough
CT: control target
= control target key end

     0   :  { %v1237_v3 = vmov 0.0|0.0   ;;  %vm1238_vm0 = vmmov 0   ;;  %v1239_v7 = vmov 0.0   ;;  %s1412_s0 = inlined_call_operand.vmem [shape: f32[2,16], index: 0, kind: input, shape index: {}]   ;;  %s1413_s1 = inlined_call_operand.vmem [shape: f32[10,8], index: 1, kind: input, shape index: {}]   ;;  %s1414_s2 = inlined_call_operand.vmem [shape: f32[16,32], index: 2, kind: input, shape index: {}]   ;;  %s1415_s3 = inlined_call_operand.vmem [shape: f32[8,32], index: 3, kind: input, shape index: {}]   ;;  %s1416_s4 = inlined_call_operand.vmem [shape: f32[8,32], index: 4, kind: input, shape index: {}]   ;;  %s1417_s5 = inlined_call_operand.hbm [shape: f32[2,32], index: 5, kind: output, shape index: {}]  }
   0x1   :  { %v28_v0 = vld [vmem:[%s1415_s3] sm:$0xff]  ;;  %v23_v2 = vld [vmem:[%s1413_s1 + $0x8] sm:$0x3]  ;;  %1117 = vmatprep.subr.bf16.mxu0 %v1237_v3  ;;  %1048 = vmatprep.mubr.msk.f32.mxu0 %vm1238_vm0, %v1239_v7 }
   0x2   :  { %v22_v1 = vld [vmem:[%s1413_s1] sm:$0xff]  ;;  %1051 = vmatprep.subr.mxu1 %v28_v0  ;;  %v27_v5 = vld [vmem:[%s1414_s2 + $0x8] sm:$0xff] }
   0x3   :  { %1193 = vtanh.f32 %v22_v1  ;;  %v26_v4 = vld [vmem:[%s1414_s2] sm:$0xff]  ;;  %1052 = vmatpush3.msra.mxu1 %v28_v0 }
   0x4   :  { %1195 = vtanh.f32 %v23_v2  ;;  %v1118_v6 = vpack.c.bf16 %v27_v5, %v26_v4 }
   0x5   :  { %10 = vsyncpa [#allocation3], 0  ;;  %v21_v8 = vld [vmem:[%s1412_s0] sm:$0x3]  ;;  %vm30_vm1 = vcmask 130048   ;;  %vm104_vm2 = vcmask 64512  }
   0x6   :  { %1119 = vmatpush3.bf16.msra.mxu0 %v1118_v6  ;;  %vm1310_vm3 = vmpackc.low %vm104_vm2, %vm104_vm2  ;;  %s1240_s0 = smov 120   ;;  %v29_v18 = vld [vmem:[%s1416_s4] sm:$0xff]  ;;  %vm341_vm4 = vcmask 74752   ;;  %vm357_vm5 = vcmask 1041408   ;;  %vm1241_vm6 = vmmov 1   ;;  %vm353_vm8 = vcmask 80896  }
   0x7   :  { %1120 = vmatprep.subr.bf16.mxu0 %v1237_v3  ;;  %1056 = vmatprep.subr.mxu1 %v29_v18  ;;  %vm1336_vm7 = vmpackc.low %vm357_vm5, %vm1241_vm6  ;;  %s1242_s4 = smov 112   ;;  %s1243_s29 = smov 104   ;;  %vm968_vm9 = vcmask 195584   ;;  %vm970_vm10 = vcmask 254976  }
   0x8   :  { %s1244_s30 = smov 8   ;;  %s1245_s6 = smov 16  }
   0x9   :  { %1049 = vmatmul.mubr.msk.f32.vlgmr.msra.gmra.mrb[0].mxu0 %vm30_vm1, %v21_v8  ;;  %s1246_s7 = smov 24   ;;  %s1247_s8 = smov [#allocation2]  }
   0xa   :  { %1065 = vmatprep.mubr.msk.f32.mxu0 %vm1238_vm0, %v1239_v7  ;;  %s978_s9 = sshll.u32 %s1247_s8, 4  ;;  %s979_s9 = int_to_ptr.vmem [resolvable:$true] %s978_s9 }
   0xb   :  { %s1213_s10 = scalar_lea.vmem %s979_s9, 32  ;;  %p1218_p1 = scmp.lt.s32.totalorder %s979_s9, %s979_s9 }
   0xc   :  { %p1214_p0 = scmp.ne.s32.totalorder %s979_s9, %s1213_s10  ;;  %p1219_p2 = scmp.lt.s32.totalorder %s1213_s10, %s1213_s10 }
   0xd   :  { %v1194_v9 = vpop.eup %1193 }
   0xe   :  { %v1196_v10 = vpop.eup %1195  ;;  %1053 = vmatprep.mubr.msk.f32.mxu1 %vm104_vm2, %v1194_v9  ;;  %p1220_p3 = por %p1219_p2, %p1218_p1 }
   0xf   :  { %1054 = vmatmul.mubr.msk.f32.vlgmr.msra.gmra.mrb[0].mxu1 %vm104_vm2, %v1196_v10 }
  0x10   :  { %1058 = vmatprep.mubr.msk.f32.mxu1 %vm104_vm2, %v1194_v9  ;;  %1057 = vmatpush3.msra.mxu1 %v29_v18  ;;  %p1221_p4 = pnand %p1220_p3, %p1214_p0 }
  0x11   :  { %1124 = vmatprep.subr.bf16.mxu1 %v1237_v3 }
  0x13   :  { %1059 = vmatmul.mubr.msk.f32.vlgmr.msra.gmra.mrb[2].mxu1 %vm104_vm2, %v1196_v10 }
  0x14   :  { %1072 = vmatprep.mubr.msk.f32.mxu1 %vm1238_vm0, %v1239_v7 }
  0xdc   :  { %v1306_v11 = vpop.f32.mrb[0].mxu0 }
  0xdd   :  { %v1050_v12 = vpop.f32.mrb[1].mxu0 }
  0xe2   :  { %v1055_v13 = vpop.f32.mrb[0].mxu1 }
  0xe3   :  { %v177_v14 = vpop.f32.mrb[1].mxu1 }
  0xe4   :  { %v1121_v16 = vpack.c.bf16 %v1055_v13, %v177_v14  ;;  %v1314_v17 = vpack.i.bf16 %v1055_v13, %v177_v14 }
  0xe6   :  { %1164 = vrot.lane.b32.xlu1 %v1314_v17, %s1240_s0  ;;  %1123 = vmatpush3.bf16.xpose.msk.msra.mxu0 %vm1310_vm3, %v1121_v16  ;;  %v1060_v23 = vpop.f32.mrb[2].mxu1 }
  0xe7   :  { %1132 = vmatprep.subr.bf16.mxu0 %v1237_v3  ;;  %v252_v29 = vpop.f32.mrb[3].mxu1 }
  0xe8   :  { %v1125_v30 = vpack.c.bf16 %v1060_v23, %v252_v29  ;;  %v1340_v32 = vpack.i.bf16 %v1060_v23, %v252_v29 }
  0xea   :  { %431 = vrot.lane.b32.xlu1 %v1306_v11, %s1240_s0  ;;  %1127 = vmatpush3.bf16.msk.msra.mxu1 %vm1336_vm7, %v1125_v30 }
  0xeb   :  { %1128 = vmatprep.subr.bf16.mxu1 %v1237_v3 }
  0xed   :  { %1066 = vmatmul.mubr.msk.f32.vlgmr.msra.gmra.mrb[2].mxu0 %vm104_vm2, %v1306_v11 }
  0xee   :  { %1086 = vmatprep.mubr.msk.f32.mxu0 %vm1238_vm0, %v1239_v7 }
 0x158   :  { %v1165_v34 = vpop.permute.xlu1 %1164 }
 0x159   :  { %v1167_v35 = vunpack.i.h.bf16 %v1165_v34  ;;  %v1166_v36 = vunpack.i.l.bf16 %v1165_v34 }
 0x15b   :  { %v1129_v39 = vpack.c.bf16 %v1167_v35, %v1166_v36 }
 0x15c   :  { %v432_v40 = vpop.permute.xlu1 %431 }
 0x1c0   :  { %v336_v19 = vpop.f32.mrb[2].mxu0 }
 0x1c1   :  { %v340_v20 = vmul.f32 0.35355338, %v336_v19  ;;  %v1067_v21 = vpop.f32.mrb[3].mxu0 }
 0x1c3   :  { %v342_v22 = vsel %vm341_vm4, %v340_v20, -inf }
 0x1c4   :  { %343 = vmax.xlane.f32.xlu0 %v342_v22 }
 0x251   :  { %v344_v24 = vpop.xlane.xlu0 %343 }
 0x252   :  { %v345_v25 = vsub.f32 %v340_v20, %v344_v24 }
 0x254   :  { %v346_v26 = vmul.f32 1.442695, %v345_v25 }
 0x256   :  { %1197 = vpow2.f32 %v346_v26 }
 0x260   :  { %v1198_v27 = vpop.eup %1197 }
 0x261   :  { %v348_v28 = vsel %vm341_vm4, %v1198_v27, 0.0 }
 0x262   :  { %349 = vadd.xlane.f32.xlu0 %v348_v28 }
 0x2ef   :  { %v350_v33 = vpop.xlane.xlu0 %349 }
 0x2f0   :  { %1199 = vrcp.f32 %v350_v33 }
 0x2fa   :  { %v1200_v37 = vpop.eup %1199 }
 0x2fb   :  { %v352_v38 = vmul.f32 %v1200_v37, %v1198_v27 }
 0x2fd   :  { %1073 = vmatmul.mubr.msk.f32.vlgmr.msra.gmra.mrb[4].mxu1 %vm353_vm8, %v352_v38 }
 0x2fe   :  { %1131 = vmatpush3.bf16.xpose.msk.msra.mxu1 %vm1310_vm3, %v1129_v39  ;;  %1079 = vmatprep.mubr.msk.f32.mxu1 %vm1238_vm0, %v1239_v7 }
 0x2ff   :  { %1140 = vmatprep.subr.bf16.mxu1 %v1237_v3 }
 0x305   :  { %1080 = vmatmul.mubr.msk.f32.vlgmr.msra.gmra.mrb[6].mxu1 %vm104_vm2, %v432_v40 }
 0x306   :  { %1100 = vmatprep.mubr.msk.f32.mxu1 %vm1238_vm0, %v1239_v7 }
 0x3d0   :  { %v1354_v41 = vpop.f32.mrb[4].mxu1 }
 0x3d1   :  { %v1074_v42 = vpop.f32.mrb[5].mxu1 }
 0x3d8   :  { %v509_v43 = vpop.f32.mrb[6].mxu1 }
 0x3d9   :  { %v513_v44 = vmul.f32 0.35355338, %v509_v43  ;;  %v1081_v45 = vpop.f32.mrb[7].mxu1 }
 0x3db   :  { %v514_v46 = vsel %vm341_vm4, %v513_v44, -inf }
 0x3dc   :  { %515 = vmax.xlane.f32.xlu0 %v514_v46 }
 0x3f2   :  { %1169 = vrot.lane.b32.xlu0 %v1340_v32, %s1240_s0 }
 0x3f6   :  { %1174 = vrot.lane.b32.xlu0 %v1314_v17, %s1242_s4 }
 0x3fa   :  { %606 = vrot.lane.b32.xlu0 %v1306_v11, %s1242_s4 }
 0x469   :  { %v516_v47 = vpop.xlane.xlu0 %515 }
 0x46a   :  { %v517_v48 = vsub.f32 %v513_v44, %v516_v47 }
 0x46c   :  { %v518_v49 = vmul.f32 1.442695, %v517_v48 }
 0x46d   :  { %v1170_v50 = vpop.permute.xlu0 %1169 }
 0x46e   :  { %1201 = vpow2.f32 %v518_v49  ;;  %v1172_v51 = vunpack.i.h.bf16 %v1170_v50  ;;  %v1171_v52 = vunpack.i.l.bf16 %v1170_v50 }
 0x470   :  { %v1133_v53 = vpack.c.bf16 %v1172_v51, %v1171_v52 }
 0x471   :  { %v1175_v60 = vpop.permute.xlu0 %1174 }
 0x472   :  { %1135 = vmatpush3.bf16.msk.msra.mxu0 %vm1336_vm7, %v1133_v53  ;;  %v1177_v62 = vunpack.i.h.bf16 %v1175_v60  ;;  %v1176_v63 = vunpack.i.l.bf16 %v1175_v60 }
 0x473   :  { %1136 = vmatprep.subr.bf16.mxu0 %v1237_v3 }
 0x474   :  { %v1137_v2 = vpack.c.bf16 %v1177_v62, %v1176_v63 }
 0x475   :  { %v607_v4 = vpop.permute.xlu0 %606 }
 0x478   :  { %v1202_v54 = vpop.eup %1201 }
 0x479   :  { %v520_v55 = vsel %vm341_vm4, %v1202_v54, 0.0 }
 0x47a   :  { %521 = vadd.xlane.f32.xlu1 %v520_v55 }
 0x48b   :  { %1179 = vrot.lane.b32.xlu1 %v1340_v32, %s1242_s4 }
 0x48f   :  { %1184 = vrot.lane.b32.xlu1 %v1314_v17, %s1243_s29 }
 0x507   :  { %v522_v56 = vpop.xlane.xlu1 %521 }
 0x508   :  { %1203 = vrcp.f32 %v522_v56 }
 0x50b   :  { %v1180_v57 = vpop.permute.xlu1 %1179 }
 0x50c   :  { %v1182_v58 = vunpack.i.h.bf16 %v1180_v57  ;;  %v1181_v59 = vunpack.i.l.bf16 %v1180_v57 }
 0x50e   :  { %v1141_v61 = vpack.c.bf16 %v1182_v58, %v1181_v59 }
 0x50f   :  { %v1185_v18 = vpop.permute.xlu1 %1184 }
 0x510   :  { %1143 = vmatpush3.bf16.msk.msra.mxu1 %vm1336_vm7, %v1141_v61  ;;  %v1187_v20 = vunpack.i.h.bf16 %v1185_v18  ;;  %v1186_v21 = vunpack.i.l.bf16 %v1185_v18 }
 0x511   :  { %1144 = vmatprep.subr.bf16.mxu1 %v1237_v3 }
 0x512   :  { %v1204_v0 = vpop.eup %1203  ;;  %v1145_v24 = vpack.c.bf16 %v1187_v20, %v1186_v21 }
 0x513   :  { %v524_v1 = vmul.f32 %v1204_v0, %v1202_v54 }
 0x515   :  { %1087 = vmatmul.mubr.msk.f32.vlgmr.msra.gmra.mrb[4].mxu0 %vm353_vm8, %v524_v1 }
 0x516   :  { %1139 = vmatpush3.bf16.xpose.msk.msra.mxu0 %vm1310_vm3, %v1137_v2  ;;  %1093 = vmatprep.mubr.msk.f32.mxu0 %vm1238_vm0, %v1239_v7 }
 0x517   :  { %1148 = vmatprep.subr.bf16.mxu0 %v1237_v3 }
 0x51d   :  { %1094 = vmatmul.mubr.msk.f32.vlgmr.msra.gmra.mrb[6].mxu0 %vm104_vm2, %v607_v4 }
 0x51e   :  { %1114 = vmatprep.mubr.msk.f32.mxu0 %vm1238_vm0, %v1239_v7 }
 0x5e8   :  { %v602_v5 = vpop.f32.mrb[4].mxu0 }
 0x5e9   :  { %v1088_v6 = vpop.f32.mrb[5].mxu0 }
 0x5f0   :  { %v684_v8 = vpop.f32.mrb[6].mxu0 }
 0x5f1   :  { %v688_v9 = vmul.f32 0.35355338, %v684_v8  ;;  %v1095_v10 = vpop.f32.mrb[7].mxu0 }
 0x5f3   :  { %v689_v12 = vsel %vm341_vm4, %v688_v9, -inf }
 0x5f4   :  { %690 = vmax.xlane.f32.xlu0 %v689_v12 }
 0x681   :  { %v691_v13 = vpop.xlane.xlu0 %690 }
 0x682   :  { %v692_v14 = vsub.f32 %v688_v9, %v691_v13 }
 0x684   :  { %v693_v16 = vmul.f32 1.442695, %v692_v14 }
 0x686   :  { %1205 = vpow2.f32 %v693_v16 }
 0x690   :  { %v1206_v17 = vpop.eup %1205 }
 0x691   :  { %v695_v3 = vsel %vm341_vm4, %v1206_v17, 0.0 }
 0x692   :  { %696 = vadd.xlane.f32.xlu1 %v695_v3 }
 0x6a3   :  { %780 = vrot.lane.b32.xlu1 %v1306_v11, %s1243_s29 }
 0x71f   :  { %v697_v19 = vpop.xlane.xlu1 %696 }
 0x720   :  { %1207 = vrcp.f32 %v697_v19 }
 0x723   :  { %v781_v25 = vpop.permute.xlu1 %780 }
 0x72a   :  { %v1208_v22 = vpop.eup %1207 }
 0x72b   :  { %v699_v23 = vmul.f32 %v1208_v22, %v1206_v17 }
 0x72d   :  { %1101 = vmatmul.mubr.msk.f32.vlgmr.msra.gmra.mrb[8].mxu1 %vm353_vm8, %v699_v23 }
 0x72e   :  { %1147 = vmatpush3.bf16.xpose.msk.msra.mxu1 %vm1310_vm3, %v1145_v24  ;;  %1107 = vmatprep.mubr.msk.f32.mxu1 %vm1238_vm0, %v1239_v7 }
 0x735   :  { %1108 = vmatmul.mubr.msk.f32.vlgmr.msra.gmra.mrb[10].mxu1 %vm104_vm2, %v781_v25 }
 0x800   :  { %v776_v11 = vpop.f32.mrb[8].mxu1 }
 0x801   :  { %v1102_v26 = vpop.f32.mrb[9].mxu1 }
 0x808   :  { %v858_v27 = vpop.f32.mrb[10].mxu1 }
 0x809   :  { %v862_v28 = vmul.f32 0.35355338, %v858_v27  ;;  %v1109_v29 = vpop.f32.mrb[11].mxu1 }
 0x80b   :  { %v863_v30 = vsel %vm341_vm4, %v862_v28, -inf }
 0x80c   :  { %864 = vmax.xlane.f32.xlu0 %v863_v30 }
 0x822   :  { %1189 = vrot.lane.b32.xlu0 %v1340_v32, %s1243_s29 }
 0x826   :  { %955 = vrot.lane.b32.xlu0 %v602_v5, %s1244_s30 }
 0x82a   :  { %959 = vrot.lane.b32.xlu0 %v776_v11, %s1245_s6 }
 0x899   :  { %v865_v15 = vpop.xlane.xlu0 %864 }
 0x89a   :  { %v866_v7 = vsub.f32 %v862_v28, %v865_v15 }
 0x89c   :  { %v867_v33 = vmul.f32 1.442695, %v866_v7 }
 0x89d   :  { %v1190_v34 = vpop.permute.xlu0 %1189 }
 0x89e   :  { %1209 = vpow2.f32 %v867_v33  ;;  %v1192_v35 = vunpack.i.h.bf16 %v1190_v34  ;;  %v1191_v36 = vunpack.i.l.bf16 %v1190_v34 }
 0x8a0   :  { %v1149_v37 = vpack.c.bf16 %v1192_v35, %v1191_v36 }
 0x8a1   :  { %v956_v45 = vpop.permute.xlu0 %955 }
 0x8a2   :  { %1151 = vmatpush3.bf16.msk.msra.mxu0 %vm1336_vm7, %v1149_v37  ;;  %v966_v31 = vsel %vm104_vm2, %v1354_v41, %v956_v45 }
 0x8a5   :  { %v960_v46 = vpop.permute.xlu0 %959 }
 0x8a6   :  { %v967_v47 = vsel %vm30_vm1, %v966_v31, %v960_v46 }
 0x8a8   :  { %v1210_v38 = vpop.eup %1209 }
 0x8a9   :  { %v869_v39 = vsel %vm341_vm4, %v1210_v38, 0.0 }
 0x8aa   :  { %870 = vadd.xlane.f32.xlu1 %v869_v39 }
 0x937   :  { %v871_v32 = vpop.xlane.xlu1 %870 }
 0x938   :  { %1211 = vrcp.f32 %v871_v32 }
 0x942   :  { %v1212_v40 = vpop.eup %1211 }
 0x943   :  { %v873_v42 = vmul.f32 %v1212_v40, %v1210_v38 }
 0x945   :  { %1115 = vmatmul.mubr.msk.f32.vlgmr.msra.gmra.mrb[8].mxu0 %vm353_vm8, %v873_v42 }
 0xa18   :  { %v950_v43 = vpop.f32.mrb[8].mxu0 }
 0xa19   :  { %963 = vrot.lane.b32.xlu0 %v950_v43, %s1246_s7  ;;  %v1116_v44 = vpop.f32.mrb[9].mxu0 }
 0xa8b   :  { %v964_v48 = vpop.permute.xlu0 %963 }
 0xa8c   :  { %v969_v49 = vsel %vm968_vm9, %v967_v47, %v964_v48 }
 0xa8d   :  { %971 = vst.msk [vmem:[#allocation2] sm:$0x3] %vm970_vm10, %v969_v49 }
 0xa8e   :  { %1224 = shalt.err (!%p1221_p4)
}
 0xa8f   :  { %s1225_s13 = scalar_lea.hbm %s1417_s5, 32 }
 0xa90   :  { %p1226_p5 = scmp.ne.s32.totalorder %s1417_s5, %s1225_s13  ;;  %p1229_p6 = scmp.lt.u32.totalorder %s1225_s13, %s1417_s5 }
 0xa92   :  { %p1231_p7 = pnand %p1229_p6, %p1226_p5 }
 0xa94   :  { %1234 = shalt.err (!%p1231_p7)
}
 0xa95   :  { %981 = dma.vmem_to_hbm [thread:$0]  %s979_s9, 32, %s1417_s5, [#allocation3]  }
 0xa96   :  { %1235 = dma.done.wait [#allocation3], 32  }
 0xa97   :  { %1236 = vsyncadd [#allocation3], 4294967264 }
 0xa98   :  { %985 = vsyncpa [#allocation3], 1 }

</bundles_post_ra>
